<compile_context>
chip_gen: v7x
topology: tpu7x:2x2x1
jax: 0.10.0
libtpu: 0.0.40
codegen_flags: <defaults>
</compile_context>

<pallas_src>
import functools

import jax
import jax.numpy as jnp
from jax import lax
from jax.experimental import pallas as pl
from jax.experimental.pallas import tpu as pltpu


# ---------------------------------------------------------------------------
# Kernel
# ---------------------------------------------------------------------------
def _local_op_kernel(x_ref, w1_ref, b1_ref, w2_ref, b2_ref, o_ref, *, seq, chunk):
    # x_ref:  (tb*seq, d)   bf16 rows (tb groups of seq rows each)
    # w1_ref: (d, ocp)      bf16, conv1^T with BN1 scale folded in
    # b1_ref: (1, ocp)      f32 BN1 shift
    # w2_ref: (ocp, ocp)    bf16, conv2^T with BN2 scale folded in
    # b2_ref: (1, ocp)      f32 BN2 shift
    # o_ref:  (tb, ocp)     f32 per-group max over seq
    tb, ocp = o_ref.shape
    num_chunks = tb // chunk

    w1 = w1_ref[...]
    b1 = b1_ref[...]
    w2 = w2_ref[...]
    b2 = b2_ref[...]

    def body(c, carry):
        g0 = pl.multiple_of(c * chunk, 8)
        r0 = pl.multiple_of(c * (chunk * seq), 8)

        x = x_ref[pl.ds(r0, chunk * seq), :]                           # bf16
        h = jnp.dot(x, w1, preferred_element_type=jnp.float32)         # MXU
        h = jnp.maximum(h + b1, 0.0)                                   # f32 VPU
        z = jnp.dot(h.astype(jnp.bfloat16), w2,
                    preferred_element_type=jnp.float32)                # MXU
        z = jnp.maximum(z + b2, 0.0)                                   # f32 VPU
        # seq is normally a multiple of 8 sublanes -> cheap split, XLU max.
        o_ref[pl.ds(g0, chunk), :] = jnp.max(z.reshape(chunk, seq, ocp), axis=1)
        return carry

    lax.fori_loop(0, num_chunks, body, 0, unroll=True)


# ---------------------------------------------------------------------------
# Parameter preparation (hoisted out of the per-call hot path)
# ---------------------------------------------------------------------------
def _round_up(x, m):
    return ((x + m - 1) // m) * m


def local_op_prepare(w1, gamma1, beta1, mean1, var1,
                     w2, gamma2, beta2, mean2, var2, eps=1e-5):
    """Fold eval-mode BatchNorm into bf16 conv weights once per layer."""
    oc, d = w1.shape
    # Lane-pad out_channels: 128 (full v5e MXU width); use 256 for large oc so
    # v6e/v7x 2x256x256 MXUs see full-width N/K on the second matmul.
    ocp = _round_up(oc, 256) if oc > 128 else _round_up(oc, 128)

    scale1 = (gamma1 / jnp.sqrt(var1 + eps)).astype(jnp.float32)
    shift1 = (beta1 - mean1 * scale1).astype(jnp.float32)
    scale2 = (gamma2 / jnp.sqrt(var2 + eps)).astype(jnp.float32)
    shift2 = (beta2 - mean2 * scale2).astype(jnp.float32)

    w1t = jnp.asarray(w1, jnp.float32).T * scale1[None, :]     # (d, oc)
    w2t = jnp.asarray(w2, jnp.float32).T * scale2[None, :]     # (oc, oc)

    w1p = jnp.zeros((d, ocp), jnp.float32).at[:, :oc].set(w1t).astype(jnp.bfloat16)
    w2p = jnp.zeros((ocp, ocp), jnp.float32).at[:oc, :oc].set(w2t).astype(jnp.bfloat16)
    b1p = jnp.zeros((1, ocp), jnp.float32).at[0, :oc].set(shift1)
    b2p = jnp.zeros((1, ocp), jnp.float32).at[0, :oc].set(shift2)
    return {"w1p": w1p, "b1p": b1p, "w2p": w2p, "b2p": b2p, "oc": oc, "d": d}


# ---------------------------------------------------------------------------
# Tiling selection from a VMEM budget (generation-conservative)
# ---------------------------------------------------------------------------
_VMEM_BUDGET = 12 * 1024 * 1024   # fits v5e's 16 MiB default scoped limit
_MAX_TB = 512                     # keeps the unrolled in-kernel chunk loop short
_CHUNK_GROUPS = 64                # groups per in-kernel chunk (bounds h/z temps)


def _choose_tiling(B, s, d, ocp):
    d_lanes = max(_round_up(d, 128), 128)
    # per-group per-step bytes: bf16 x tile (double-buffered, lane-padded) +
    # f32 output tile (double-buffered).
    per_group = 2 * s * d_lanes * 2 + 2 * ocp * 4
    # grid-invariant / chunk-local bytes: bf16 weights + f32 shifts (double-
    # buffered by the pipeline) + f32 h/z chunk temporaries.
    fixed = (2 * (d * ocp + ocp * ocp) * 2
             + 2 * 2 * ocp * 4
             + 2 * _CHUNK_GROUPS * s * ocp * 4)
    tb_cap = max(8, (_VMEM_BUDGET - fixed) // per_group)
    tb_cap = min(tb_cap, _MAX_TB)
    tb_cap = max(8, (tb_cap // 8) * 8)

    if B <= tb_cap:
        # Small problem: still aim for >= 2 grid steps so both v7x TensorCores
        # get a share of the "parallel" axis.
        if B >= 16 and B % 2 == 0 and (B // 2) % 8 == 0:
            tb = B // 2
        else:
            tb = B
    else:
        # Prefer a divisor of B (multiple of 8): no partial blocks, no padding.
        tb = 0
        for cand in range(tb_cap, 7, -1):
            if cand % 8 == 0 and B % cand == 0:
                tb = cand
                break
        if tb == 0:
            tb = tb_cap   # last block is partial; Pallas masks the OOB rows.

    if tb <= _CHUNK_GROUPS or tb % 8 != 0:
        chunk = tb
    else:
        chunk = _CHUNK_GROUPS
        while tb % chunk:
            chunk //= 2
    return tb, max(chunk, 1)


# ---------------------------------------------------------------------------
# Hot path
# ---------------------------------------------------------------------------
def local_op_apply(x, params):
    """x: (b, n, s, d) float -> (b, out_channels, n) float32."""
    b, n, s, d = x.shape
    assert d == params["d"], (d, params["d"])
    oc = params["oc"]
    w1p, b1p, w2p, b2p = params["w1p"], params["b1p"], params["w2p"], params["b2p"]
    ocp = w2p.shape[0]
    B = b * n

    tb, chunk = _choose_tiling(B, s, d, ocp)
    grid = pl.cdiv(B, tb)

    # bf16 rows for the MXU; channels-last so both 1x1 convs are matmuls.
    x_rows = x.reshape(B * s, d).astype(jnp.bfloat16)

    kernel = functools.partial(_local_op_kernel, seq=s, chunk=chunk)

    out = pl.pallas_call(
        kernel,
        out_shape=jax.ShapeDtypeStruct((B, ocp), jnp.float32),
        grid_spec=pltpu.PrefetchScalarGridSpec(
            num_scalar_prefetch=0,
            grid=(grid,),
            in_specs=[
                pl.BlockSpec((tb * s, d), lambda i: (i, 0)),
                pl.BlockSpec((d, ocp), lambda i: (0, 0)),
                pl.BlockSpec((1, ocp), lambda i: (0, 0)),
                pl.BlockSpec((ocp, ocp), lambda i: (0, 0)),
                pl.BlockSpec((1, ocp), lambda i: (0, 0)),
            ],
            out_specs=pl.BlockSpec((tb, ocp), lambda i: (i, 0)),
        ),
        compiler_params=pltpu.CompilerParams(
            dimension_semantics=("parallel",),
            vmem_limit_bytes=32 * 1024 * 1024,
        ),
    )(x_rows, w1p, b1p, w2p, b2p)

    # Drop channel padding; (B, oc) -> (b, n, oc) -> (b, oc, n)
    out = out[:, :oc]
    return out.reshape(b, n, oc).transpose(0, 2, 1)


def local_op(x, w1, gamma1, beta1, mean1, var1,
             w2, gamma2, beta2, mean2, var2, eps=1e-5):
    """Convenience wrapper (prepare + apply). Prefer calling
    local_op_prepare once per layer and local_op_apply per step."""
    params = local_op_prepare(w1, gamma1, beta1, mean1, var1,
                              w2, gamma2, beta2, mean2, var2, eps)
    return local_op_apply(x, params)


# ---------------------------------------------------------------------------
# Demo / self-check
# ---------------------------------------------------------------------------
if __name__ == "__main__":
    # Small shapes consistent with the module's forward:
    # x: (b, n, s, d); in_channels = d, out_channels chosen = 64.
    b, n, s, d = 2, 8, 16, 32
    oc = 64

    key = jax.random.PRNGKey(0)
    kx, kw1, kw2, kg1, kb1, km1, kg2, kb2, km2 = jax.random.split(key, 9)

    x = jax.random.normal(kx, (b, n, s, d), dtype=jnp.float32)

    # Conv1d(kernel_size=1, bias=False) weights, squeezed to (out, in).
    w1 = jax.random.normal(kw1, (oc, d), dtype=jnp.float32) * 0.1
    w2 = jax.random.normal(kw2, (oc, oc), dtype=jnp.float32) * 0.1

    # BatchNorm1d params (deterministic synthetic values, eval-mode stats).
    gamma1 = 1.0 + 0.05 * jax.random.normal(kg1, (oc,), dtype=jnp.float32)
    beta1 = 0.05 * jax.random.normal(kb1, (oc,), dtype=jnp.float32)
    mean1 = 0.1 * jax.random.normal(km1, (oc,), dtype=jnp.float32)
    var1 = jnp.ones((oc,), dtype=jnp.float32)

    gamma2 = 1.0 + 0.05 * jax.random.normal(kg2, (oc,), dtype=jnp.float32)
    beta2 = 0.05 * jax.random.normal(kb2, (oc,), dtype=jnp.float32)
    mean2 = 0.1 * jax.random.normal(km2, (oc,), dtype=jnp.float32)
    var2 = jnp.ones((oc,), dtype=jnp.float32)

    # Fold BN / pad weights once (hoisted), then run the kernel.
    params = local_op_prepare(w1, gamma1, beta1, mean1, var1,
                              w2, gamma2, beta2, mean2, var2)
    y = local_op_apply(x, params)
    jax.block_until_ready(y)

    assert y.shape == (b, oc, n), y.shape

    # Pure-JAX f32 reference for sanity (kernel uses bf16 MXU inputs with f32
    # accumulation, so tolerances are loosened accordingly).
    def ref(x):
        eps = 1e-5
        xf = x.reshape(b * n, s, d)
        sc1 = gamma1 / jnp.sqrt(var1 + eps)
        sc2 = gamma2 / jnp.sqrt(var2 + eps)
        h = jnp.einsum("bsd,od->bso", xf, w1)
        h = jnp.maximum(h * sc1 + (beta1 - mean1 * sc1), 0.0)
        z = jnp.einsum("bso,po->bsp", h, w2)
        z = jnp.maximum(z * sc2 + (beta2 - mean2 * sc2), 0.0)
        z = jnp.max(z, axis=1)                      # (B, oc)
        return z.reshape(b, n, oc).transpose(0, 2, 1)

    ref_y = ref(x)
    assert jnp.allclose(y, ref_y, atol=5e-2, rtol=5e-2), float(
        jnp.max(jnp.abs(y - ref_y)))

    print("KERNEL_OK")
</pallas_src>

<mosaic_0001>
module attributes {stable_mosaic.version = 11 : i64} {
  func.func @_local_op_kernel(%arg0: i32, %arg1: memref<128x32xbf16, #tpu.memory_space<vmem>>, %arg2: memref<32x128xbf16, #tpu.memory_space<vmem>>, %arg3: memref<1x128xf32, #tpu.memory_space<vmem>>, %arg4: memref<128x128xbf16, #tpu.memory_space<vmem>>, %arg5: memref<1x128xf32, #tpu.memory_space<vmem>>, %arg6: memref<8x128xf32, #tpu.memory_space<vmem>>) attributes {dimension_semantics = [#tpu.dimension_semantics<parallel>], iteration_bounds = array<i64: 2>, scalar_prefetch = 0 : i64, scratch_operands = 0 : i64, tpu.core_type = #tpu.core_type<tc>, window_params = [{transform_indices = @transform_0, window_bounds = array<i64: 128, 32>}, {pipeline_mode = #tpu.pipeline_mode<synchronous>, transform_indices = @transform_1, window_bounds = array<i64: 32, 128>}, {pipeline_mode = #tpu.pipeline_mode<synchronous>, transform_indices = @transform_2, window_bounds = array<i64: 1, 128>}, {pipeline_mode = #tpu.pipeline_mode<synchronous>, transform_indices = @transform_3, window_bounds = array<i64: 128, 128>}, {pipeline_mode = #tpu.pipeline_mode<synchronous>, transform_indices = @transform_4, window_bounds = array<i64: 1, 128>}, {transform_indices = @transform_5, window_bounds = array<i64: 8, 128>}]} {
    %c0 = arith.constant 0 : index
    %c0_0 = arith.constant 0 : index
    %0 = vector.load %arg2[%c0, %c0_0] : memref<32x128xbf16, #tpu.memory_space<vmem>>, vector<32x128xbf16>
    %c0_1 = arith.constant 0 : index
    %c0_2 = arith.constant 0 : index
    %1 = vector.load %arg3[%c0_1, %c0_2] : memref<1x128xf32, #tpu.memory_space<vmem>>, vector<1x128xf32>
    %c0_3 = arith.constant 0 : index
    %c0_4 = arith.constant 0 : index
    %2 = vector.load %arg4[%c0_3, %c0_4] : memref<128x128xbf16, #tpu.memory_space<vmem>>, vector<128x128xbf16>
    %c0_5 = arith.constant 0 : index
    %c0_6 = arith.constant 0 : index
    %3 = vector.load %arg5[%c0_5, %c0_6] : memref<1x128xf32, #tpu.memory_space<vmem>>, vector<1x128xf32>
    %c0_i32 = arith.constant 0 : i32
    %c8_i32 = arith.constant 8 : i32
    %4 = arith.muli %c0_i32, %c8_i32 : i32
    %5 = tpu.assume_multiple %4, 8 : i32
    %c128_i32 = arith.constant 128 : i32
    %6 = arith.muli %c0_i32, %c128_i32 : i32
    %7 = tpu.assume_multiple %6, 8 : i32
    %8 = arith.index_cast %7 : i32 to index
    %c0_7 = arith.constant 0 : index
    %9 = vector.load %arg1[%8, %c0_7] : memref<128x32xbf16, #tpu.memory_space<vmem>>, vector<128x32xbf16>
    %cst = arith.constant dense<0.000000e+00> : vector<128x128xf32>
    %10 = tpu.matmul %9, %0, %cst {dimension_numbers = #tpu.dot_dimension_numbers<[1], [0], [0], [1], [0, 0, 1, 1], [], []>} : vector<128x32xbf16>, vector<32x128xbf16>, vector<128x128xf32> -> vector<128x128xf32>
    %11 = vector.broadcast %1 : vector<1x128xf32> to vector<128x128xf32>
    %12 = arith.addf %10, %11 : vector<128x128xf32>
    %cst_8 = arith.constant 0.000000e+00 : f32
    %13 = vector.broadcast %cst_8 : f32 to vector<128x128xf32>
    %14 = arith.maximumf %12, %13 : vector<128x128xf32>
    %15 = arith.truncf %14 : vector<128x128xf32> to vector<128x128xbf16>
    %cst_9 = arith.constant dense<0.000000e+00> : vector<128x128xf32>
    %16 = tpu.matmul %15, %2, %cst_9 {dimension_numbers = #tpu.dot_dimension_numbers<[1], [0], [0], [1], [0, 0, 1, 1], [], []>} : vector<128x128xbf16>, vector<128x128xbf16>, vector<128x128xf32> -> vector<128x128xf32>
    %17 = vector.broadcast %3 : vector<1x128xf32> to vector<128x128xf32>
    %18 = arith.addf %16, %17 : vector<128x128xf32>
    %cst_10 = arith.constant 0.000000e+00 : f32
    %19 = vector.broadcast %cst_10 : f32 to vector<128x128xf32>
    %20 = arith.maximumf %18, %19 : vector<128x128xf32>
    %21 = vector.shape_cast %20 : vector<128x128xf32> to vector<8x16x128xf32>
    %cst_11 = arith.constant dense<0xFF800000> : vector<8x128xf32>
    %22 = vector.multi_reduction <maximumf>, %21, %cst_11 [1] : vector<8x16x128xf32> to vector<8x128xf32>
    %23 = arith.index_cast %5 : i32 to index
    %c0_12 = arith.constant 0 : index
    %24 = vector.load %arg6[%23, %c0_12] : memref<8x128xf32, #tpu.memory_space<vmem>>, vector<8x128xf32>
    tpu.vector_store %arg6[%23, %c0_12], %22 {strides = array<i32>} : memref<8x128xf32, #tpu.memory_space<vmem>>, vector<8x128xf32>,
    %c1_i32 = arith.constant 1 : i32
    return
  }
  func.func @transform_0(%arg0: i32) -> (i32, i32) {
    %c0_i32 = arith.constant 0 : i32
    %c0_i32_0 = arith.constant 0 : i32
    return %arg0, %c0_i32 : i32, i32
  }
  func.func @transform_1(%arg0: i32) -> (i32, i32) {
    %c0_i32 = arith.constant 0 : i32
    %c0_i32_0 = arith.constant 0 : i32
    %c0_i32_1 = arith.constant 0 : i32
    return %c0_i32, %c0_i32_0 : i32, i32
  }
  func.func @transform_2(%arg0: i32) -> (i32, i32) {
    %c0_i32 = arith.constant 0 : i32
    %c0_i32_0 = arith.constant 0 : i32
    %c0_i32_1 = arith.constant 0 : i32
    return %c0_i32, %c0_i32_0 : i32, i32
  }
  func.func @transform_3(%arg0: i32) -> (i32, i32) {
    %c0_i32 = arith.constant 0 : i32
    %c0_i32_0 = arith.constant 0 : i32
    %c0_i32_1 = arith.constant 0 : i32
    return %c0_i32, %c0_i32_0 : i32, i32
  }
  func.func @transform_4(%arg0: i32) -> (i32, i32) {
    %c0_i32 = arith.constant 0 : i32
    %c0_i32_0 = arith.constant 0 : i32
    %c0_i32_1 = arith.constant 0 : i32
    return %c0_i32, %c0_i32_0 : i32, i32
  }
  func.func @transform_5(%arg0: i32) -> (i32, i32) {
    %c0_i32 = arith.constant 0 : i32
    %c0_i32_0 = arith.constant 0 : i32
    return %arg0, %c0_i32 : i32, i32
  }
}

</mosaic_0001>

<bundles_post_ra>
// kernel: tpu_custom_call.1
= control target key start
LH: loop header
LB: loop body
LE: loop exit
PB: predicated region body
PF: predicated region fallthrough
CT: control target
= control target key end

     0   :  { %10 = vsyncpa [#allocation3], 0  ;;  %s1244_s0 = inlined_call_operand.vmem [shape: bf16[256,32], index: 0, kind: input, shape index: {}]   ;;  %s1245_s1 = inlined_call_operand.vmem [shape: bf16[32,128], index: 1, kind: input, shape index: {}]   ;;  %s1246_s2 = inlined_call_operand.vmem [shape: f32[1,128], index: 2, kind: input, shape index: {}]   ;;  %s1247_s3 = inlined_call_operand.vmem [shape: bf16[128,128], index: 3, kind: input, shape index: {}]   ;;  %s1248_s4 = inlined_call_operand.vmem [shape: f32[1,128], index: 4, kind: input, shape index: {}]   ;;  %s1249_s5 = inlined_call_operand.hbm [shape: f32[16,128], index: 5, kind: output, shape index: {}]  }
   0x1   :  { %12 = vsyncpa [#allocation3 + $0x1], 0  ;;  %s1073_s18 = smov 0   ;;  %s1075_s19 = smov 0  }
   0x2   :  { %s1077_s20 = smov 0   ;;  %s1079_s21 = smov 0  }
   0x3 LB: > { %s1094_s22 = sadd.s32 4294967295, %s1040_s21   ;;  %s788_s23 = sadd.s32 4294967294, %s1040_s21   ;;  %s1040_s21 = sphi %s1079_s21, %s1255_s21   ;;  %s1036_s20 = sphi %s1077_s20, %s1254_s20   ;;  %s1032_s19 = sphi %s1075_s19, %s1253_s19   ;;  %s1028_s18 = sphi %s1073_s18, %s1252_s18  }
   0x4   : > { %s1098_s24 = sadd.s32 1, %s1040_s21   ;;  %s135_s25 = sadd.s32 1, %s1036_s20 }
   0x5   : > { %s132_s26 = ssub.s32 %s1040_s21, %s1098_s24  ;;  %p145_p0 = scmp.ne.s32.totalorder %s1036_s20, %s1032_s19 }
   0x6   : > { %p133_p1 = scmp.eq.s32.totalorder %s132_s26, 0  ;;  %p146_p2 = scmp.eq.s32.totalorder %s1094_s22, 1 }
   0x7   : > { %p151_p3 = scmp.ne.s32.totalorder %s1032_s19, %s1028_s18  ;;  %p152_p4 = scmp.eq.s32.totalorder %s788_s23, 1 }
   0x8   : > { %s1109_s27 = scalar_select %p133_p1, %s1036_s20, %s135_s25  }
   0x9   : > { %p1111_p5 = por %p146_p2, %p145_p0  ;;  %p1115_p6 = por %p152_p4, %p151_p3 }
   0xa   : > { %p791_p7 = scmp.ge.s32.totalorder %s1040_s21, 1  ;;  %p191_p8 = scmp.lt.s32.totalorder %s1040_s21, 3 }
   0xc   : > { %p192_p9 = pnand %p791_p7, %p191_p8 }
   0xd   : > { %v960_v0 = vld [vmem:[%s1245_s1] sm:$0xff] (!%p192_p9)   ;;  %s793_s7 = sshll.u32 (!%p192_p9), %s1094_s22, 4  ;;  %v961_v1 = vld [vmem:[%s1245_s1 + $0x8] sm:$0xff] (!%p192_p9)   ;;  %vm322_vm0 = vcmask (!%p192_p9), 261120   ;;  %v972_v4 = vld [vmem:[%s1247_s3 + $0x10] sm:$0xff] (!%p192_p9)   ;;  %vm699_vm1 = vcmask (!%p192_p9), 1041409  }
   0xe   : > { %195 = sbr.rel (%p192_p9) target bundleno = 521 (0x209), region = 40  ;;  %p220_p10 = scmp.lt.s32.totalorder (!%p192_p9), %s793_s7, 31  ;;  %853 = vmatprep.subr.bf16.mxu0 (!%p192_p9), %v960_v0  ;;  %v970_v2 = vld [vmem:[%s1247_s3] sm:$0xff] (!%p192_p9)   ;;  %v971_v3 = vld [vmem:[%s1247_s3 + $0x8] sm:$0xff] (!%p192_p9)   ;;  %v973_v8 = vld [vmem:[%s1247_s3 + $0x18] sm:$0xff] (!%p192_p9)   ;;  %vm701_vm2 = vcmask (!%p192_p9), 1042434  }
   0xf   : > { %854 = vmatpush3.bf16.msra.mxu0 (!%p192_p9), %v960_v0  ;;  %905 = vmatprep.subr.bf16.mxu1 (!%p192_p9), %v970_v2  ;;  %v974_v10 = vld [vmem:[%s1247_s3 + $0x20] sm:$0xff] (!%p192_p9)   ;;  %v975_v12 = vld [vmem:[%s1247_s3 + $0x28] sm:$0xff] (!%p192_p9)   ;;  %v976_v16 = vld [vmem:[%s1247_s3 + $0x30] sm:$0xff] (!%p192_p9)   ;;  %vm703_vm3 = vcmask (!%p192_p9), 1043459   ;;  %s216_s23 = sand.u32 (!%p192_p9), 1, %s1032_s19   ;;  %vm705_vm4 = vcmask (!%p192_p9), 1044484  }
  0x10   : > { %855 = vmatprep.subr.bf16.mxu0 (!%p192_p9), %v961_v1  ;;  %913 = vmatpush3.bf16.msra.mxu1 (!%p192_p9), %v970_v2  ;;  %v977_v17 = vld [vmem:[%s1247_s3 + $0x38] sm:$0xff] (!%p192_p9)   ;;  %v795_v18 = vld [vmem:[%s1246_s2] ss:$0 sm:$0xff] (!%p192_p9)  ;;  %vm707_vm5 = vcmask (!%p192_p9), 1045509   ;;  %s792_s25 = sshll.u32 (!%p192_p9), %s216_s23, 3  ;;  %vm709_vm6 = vcmask (!%p192_p9), 1046534  }
  0x11   : > { %906 = vmatprep.subr.bf16.mxu1 (!%p192_p9), %v971_v3  ;;  %s824_s26 = sshll.u32 (!%p192_p9), %s1094_s22, 7  ;;  %s218_s30 = scalar_lea.vmem (!%p192_p9), [#allocation2], %s792_s25  ;;  %vm711_vm7 = vcmask (!%p192_p9), 1047559  }
  0x12   : > { %s729_s6 = sshll.u32 (!%p192_p9), %s218_s30, 4  ;;  %s1202_s9 = scalar_lea.hbm (!%p192_p9), %s1249_s5, %s824_s26  ;;  %s1204_s6 = int_to_ptr.vmem [resolvable:$true] %s729_s6 }
  0x13   : > { %856 = vmatpush3.bf16.msra.mxu0 (!%p192_p9), %v961_v1  ;;  %s716_s10 = scalar_lea.sflag (!%p192_p9), [#allocation3], %s216_s23  ;;  %s978_s22 = scalar_lea.vmem (!%p192_p9), %s1204_s6, 128 }
  0x14   : > { %873 = vmatprep.subr.bf16.mxu0 (!%p192_p9), %v970_v2  ;;  %914 = vmatpush3.bf16.msra.mxu1 (!%p192_p9), %v971_v3  ;;  %p979_p11 = scmp.ne.s32.totalorder (!%p192_p9), %s1204_s6, %s978_s22  ;;  %s1042_s11 = smov (!%p192_p9), [#allocation2]  }
  0x15   : > { %s1257_s7 = smov (!%p220_p10, %s793_s7), 31  ;;  %907 = vmatprep.subr.bf16.mxu1 %v972_v4  ;;  %s982_s12 = sshll.u32 %s1042_s11, 4  ;;  %s983_s12 = int_to_ptr.vmem [resolvable:$false] %s982_s12 }
  0x16   : > { %s794_s14 = sshll.u32 %s1257_s7, 2  ;;  %p980_p12 = pnand %p979_p11, %p1111_p5 }
  0x17   : > { %s1137_s17 = scalar_lea.vmem %s1244_s0, %s794_s14  ;;  %s984_s13 = scalar_lea.vmem %s983_s12, 256 }
  0x18   : > { %v962_v5 = vld [vmem:[%s1137_s17] sm:$0xff]   ;;  %v963_v6 = vld [vmem:[%s1137_s17 + $0x8] sm:$0xff]   ;;  %v964_v7 = vld [vmem:[%s1137_s17 + $0x10] sm:$0xff]   ;;  %915 = vmatpush3.bf16.msra.mxu1 %v972_v4  ;;  %p981_p13 = pneg %p980_p12  ;;  %p985_p0 = scmp.lt.s32.totalorder %s1204_s6, %s983_s12 }
  0x19   : > { %857 = vmatprep.mubr.msk.bf16.mxu0 %vm322_vm0, %v962_v5  ;;  %v965_v9 = vld [vmem:[%s1137_s17 + $0x18] sm:$0xff]   ;;  %908 = vmatprep.subr.bf16.mxu1 %v973_v8  ;;  %v966_v11 = vld [vmem:[%s1137_s17 + $0x20] sm:$0xff]   ;;  %v967_v13 = vld [vmem:[%s1137_s17 + $0x28] sm:$0xff]   ;;  %p986_p1 = scmp.lt.s32.totalorder %s984_s13, %s978_s22 }
  0x1a   : > { %858 = vmatmul.mubr.msk.bf16.vlgmr.msra.gmra.mrb[0].mxu0 %vm322_vm0, %v963_v6  ;;  %v968_v14 = vld [vmem:[%s1137_s17 + $0x30] sm:$0xff]   ;;  %v969_v15 = vld [vmem:[%s1137_s17 + $0x38] sm:$0xff]  }
  0x1b   : > { %861 = vmatprep.mubr.msk.bf16.mxu0 %vm322_vm0, %v964_v7  ;;  %874 = vmatpush3.bf16.msra.mxu0 %v970_v2  ;;  %p987_p2 = por %p986_p1, %p985_p0 }
  0x1c   : > { %875 = vmatprep.subr.bf16.mxu0 %v971_v3  ;;  %916 = vmatpush3.bf16.msra.mxu1 %v973_v8 }
  0x1d   : > { %909 = vmatprep.subr.bf16.mxu1 %v974_v10  ;;  %p988_p3 = pnand %p987_p2, %p981_p13 }
  0x1f   : > { %876 = vmatpush3.bf16.msra.mxu0 %v971_v3 }
  0x20   : > { %877 = vmatprep.subr.bf16.mxu0 %v972_v4  ;;  %917 = vmatpush3.bf16.msra.mxu1 %v974_v10 }
  0x21   : > { %910 = vmatprep.subr.bf16.mxu1 %v975_v12 }
  0x22   : > { %862 = vmatmul.mubr.msk.bf16.gmra.mrb[4].mxu0 %vm322_vm0, %v965_v9 }
  0x23   : > { %865 = vmatprep.mubr.msk.bf16.mxu0 %vm322_vm0, %v966_v11  ;;  %878 = vmatpush3.bf16.msra.mxu0 %v972_v4  ;;  %v1179_v11 = vld [vmem:[%s1248_s4] ss:$0 sm:$0xff] }
  0x24   : > { %879 = vmatprep.subr.bf16.mxu0 %v973_v8  ;;  %918 = vmatpush3.bf16.msra.mxu1 %v975_v12 }
  0x25   : > { %911 = vmatprep.subr.bf16.mxu1 %v976_v16 }
  0x27   : > { %880 = vmatpush3.bf16.msra.mxu0 %v973_v8 }
  0x28   : > { %881 = vmatprep.subr.bf16.mxu0 %v974_v10  ;;  %919 = vmatpush3.bf16.msra.mxu1 %v976_v16 }
  0x29   : > { %912 = vmatprep.subr.bf16.mxu1 %v977_v17 }
  0x2a   : > { %866 = vmatmul.mubr.msk.bf16.gmra.mrb[8].mxu0 %vm322_vm0, %v967_v13 }
  0x2b   : > { %869 = vmatprep.mubr.msk.bf16.mxu0 %vm322_vm0, %v968_v14  ;;  %882 = vmatpush3.bf16.msra.mxu0 %v974_v10 }
  0x2c   : > { %883 = vmatprep.subr.bf16.mxu0 %v975_v12  ;;  %920 = vmatpush3.bf16.msra.mxu1 %v977_v17 }
  0x2f   : > { %884 = vmatpush3.bf16.msra.mxu0 %v975_v12 }
  0x30   : > { %885 = vmatprep.subr.bf16.mxu0 %v976_v16 }
  0x32   : > { %870 = vmatmul.mubr.msk.bf16.gmra.mrb[12].mxu0 %vm322_vm0, %v969_v15 }
  0x33   : > { %886 = vmatpush3.bf16.msra.mxu0 %v976_v16 }
  0x34   : > { %887 = vmatprep.subr.bf16.mxu0 %v977_v17 }
  0x37   : > { %888 = vmatpush3.bf16.msra.mxu0 %v977_v17 }
  0xed   : > { %v859_v19 = vpop.f32.mrb[0].mxu0 }
  0xee   : > { %v390_v20 = vadd.f32 %v859_v19, %v795_v18  ;;  %v381_v21 = vpop.f32.mrb[1].mxu0 }
  0xef   : > { %v382_v22 = vadd.f32 %v795_v18, %v381_v21  ;;  %v860_v23 = vpop.f32.mrb[2].mxu0 }
  0xf0   : > { %v393_v24 = vadd.f32 %v860_v23, %v795_v18  ;;  %v384_v25 = vpop.f32.mrb[3].mxu0  ;;  %v446_v27 = vmax.f32 %v390_v20, 0.0 }
  0xf1   : > { %v385_v26 = vadd.f32 %v795_v18, %v384_v25  ;;  %v444_v29 = vmax.f32 %v382_v22, 0.0 }
  0xf2   : > { %v447_v28 = vmax.f32 %v393_v24, 0.0 }
  0xf3   : > { %v445_v30 = vmax.f32 %v385_v26, 0.0 }
  0xf4   : > { %v461_v31 = vpack.c.bf16 %v447_v28, %v446_v27 }
  0xf5   : > { %v460_v32 = vpack.c.bf16 %v445_v30, %v444_v29  ;;  %v863_v33 = vpop.f32.mrb[4].mxu0 }
  0xf6   : > { %v406_v34 = vadd.f32 %v863_v33, %v795_v18  ;;  %v397_v35 = vpop.f32.mrb[5].mxu0 }
  0xf7   : > { %v398_v36 = vadd.f32 %v795_v18, %v397_v35  ;;  %v864_v37 = vpop.f32.mrb[6].mxu0  ;;  %889 = vmatprep.mubr.bf16.mxu0 %v460_v32 }
  0xf8   : > { %v409_v38 = vadd.f32 %v864_v37, %v795_v18  ;;  %v400_v39 = vpop.f32.mrb[7].mxu0  ;;  %890 = vmatmul.mubr.bf16.vlgmr.msra.gmra.mrb[16].mxu0 %v461_v31  ;;  %v450_v41 = vmax.f32 %v406_v34, 0.0 }
  0xf9   : > { %v401_v40 = vadd.f32 %v795_v18, %v400_v39  ;;  %v448_v43 = vmax.f32 %v398_v36, 0.0 }
  0xfa   : > { %v451_v42 = vmax.f32 %v409_v38, 0.0 }
  0xfb   : > { %v449_v44 = vmax.f32 %v401_v40, 0.0 }
  0xfc   : > { %v463_v45 = vpack.c.bf16 %v451_v42, %v450_v41 }
  0xfd   : > { %v867_v46 = vpop.f32.mrb[8].mxu0  ;;  %v462_v47 = vpack.c.bf16 %v449_v44, %v448_v43 }
  0xfe   : > { %v422_v48 = vadd.f32 %v867_v46, %v795_v18  ;;  %v413_v49 = vpop.f32.mrb[9].mxu0 }
  0xff   : > { %v414_v50 = vadd.f32 %v795_v18, %v413_v49  ;;  %v868_v51 = vpop.f32.mrb[10].mxu0  ;;  %893 = vmatprep.mubr.bf16.mxu1 %v462_v47 }
 0x100   : > { %v425_v52 = vadd.f32 %v868_v51, %v795_v18  ;;  %v416_v53 = vpop.f32.mrb[11].mxu0  ;;  %894 = vmatmul.mubr.bf16.vlgmr.msra.gmra.mrb[0].mxu1 %v463_v45  ;;  %v454_v55 = vmax.f32 %v422_v48, 0.0 }
 0x101   : > { %v417_v54 = vadd.f32 %v795_v18, %v416_v53  ;;  %v452_v57 = vmax.f32 %v414_v50, 0.0 }
 0x102   : > { %v455_v56 = vmax.f32 %v425_v52, 0.0 }
 0x103   : > { %v453_v58 = vmax.f32 %v417_v54, 0.0 }
 0x104   : > { %v465_v59 = vpack.c.bf16 %v455_v56, %v454_v55 }
 0x105   : > { %v464_v60 = vpack.c.bf16 %v453_v58, %v452_v57  ;;  %v871_v61 = vpop.f32.mrb[12].mxu0 }
 0x106   : > { %v438_v62 = vadd.f32 %v871_v61, %v795_v18  ;;  %v429_v63 = vpop.f32.mrb[13].mxu0 }
 0x107   : > { %v430_v0 = vadd.f32 %v795_v18, %v429_v63  ;;  %v872_v1 = vpop.f32.mrb[14].mxu0  ;;  %897 = vmatprep.mubr.bf16.mxu1 %v464_v60 }
 0x108   : > { %v441_v2 = vadd.f32 %v872_v1, %v795_v18  ;;  %v432_v3 = vpop.f32.mrb[15].mxu0  ;;  %898 = vmatmul.mubr.bf16.gmra.mrb[4].mxu1 %v465_v59  ;;  %v458_v5 = vmax.f32 %v438_v62, 0.0 }
 0x109   : > { %v433_v4 = vadd.f32 %v795_v18, %v432_v3  ;;  %v456_v7 = vmax.f32 %v430_v0, 0.0 }
 0x10a   : > { %v459_v6 = vmax.f32 %v441_v2, 0.0 }
 0x10b   : > { %v457_v8 = vmax.f32 %v433_v4, 0.0 }
 0x10c   : > { %v467_v9 = vpack.c.bf16 %v459_v6, %v458_v5 }
 0x10d   : > { %v466_v10 = vpack.c.bf16 %v457_v8, %v456_v7 }
 0x10f   : > { %901 = vmatprep.mubr.bf16.mxu1 %v466_v10 }
 0x110   : > { %902 = vmatmul.mubr.bf16.gmra.mrb[8].mxu1 %v467_v9 }
 0x1cb   : > { %v891_v12 = vpop.f32.mrb[16].mxu0 }
 0x1cc   : > { %v565_v13 = vadd.f32 %v891_v12, %v1179_v11  ;;  %v556_v14 = vpop.f32.mrb[17].mxu0 }
 0x1cd   : > { %v557_v15 = vadd.f32 %v1179_v11, %v556_v14  ;;  %v892_v16 = vpop.f32.mrb[18].mxu0 }
 0x1ce   : > { %v568_v17 = vadd.f32 %v892_v16, %v1179_v11  ;;  %v559_v18 = vpop.f32.mrb[19].mxu0  ;;  %v621_v20 = vmax.f32 %v565_v13, 0.0 }
 0x1cf   : > { %v560_v19 = vadd.f32 %v1179_v11, %v559_v18  ;;  %v619_v22 = vmax.f32 %v557_v15, 0.0 }
 0x1d0   : > { %v622_v21 = vmax.f32 %v568_v17, 0.0 }
 0x1d1   : > { %v620_v23 = vmax.f32 %v560_v19, 0.0 }
 0x1d2   : > { %v642_v24 = vmax.f32 %v621_v20, %v622_v21 }
 0x1d3   : > { %v635_v25 = vmax.f32 %v619_v22, %v620_v23  ;;  %v895_v26 = vpop.f32.mrb[0].mxu1 }
 0x1d4   : > { %v643_v27 = vrot.slane %v642_v24, 4  ;;  %v581_v28 = vadd.f32 %v895_v26, %v1179_v11  ;;  %v572_v29 = vpop.f32.mrb[1].mxu1 }
 0x1d5   : > { %v636_v30 = vrot.slane %v635_v25, 4  ;;  %v573_v31 = vadd.f32 %v1179_v11, %v572_v29  ;;  %v896_v32 = vpop.f32.mrb[2].mxu1 }
 0x1d6   : > { %v644_v33 = vmax.f32 %v642_v24, %v643_v27  ;;  %v584_v34 = vadd.f32 %v896_v32, %v1179_v11  ;;  %v575_v35 = vpop.f32.mrb[3].mxu1  ;;  %v625_v39 = vmax.f32 %v581_v28, 0.0 }
 0x1d7   : > { %v637_v36 = vmax.f32 %v635_v25, %v636_v30  ;;  %v576_v37 = vadd.f32 %v1179_v11, %v575_v35  ;;  %v623_v42 = vmax.f32 %v573_v31, 0.0 }
 0x1d8   : > { %v645_v38 = vrot.slane %v644_v33, 2  ;;  %v626_v40 = vmax.f32 %v584_v34, 0.0 }
 0x1d9   : > { %v638_v41 = vrot.slane %v637_v36, 2  ;;  %v624_v43 = vmax.f32 %v576_v37, 0.0 }
 0x1da   : > { %v646_v44 = vmax.f32 %v644_v33, %v645_v38  ;;  %v656_v45 = vmax.f32 %v625_v39, %v626_v40 }
 0x1db   : > { %v639_v46 = vmax.f32 %v637_v36, %v638_v41  ;;  %v649_v47 = vmax.f32 %v623_v42, %v624_v43  ;;  %v899_v48 = vpop.f32.mrb[4].mxu1 }
 0x1dc   : > { %v647_v49 = vrot.slane %v646_v44, 1  ;;  %v657_v50 = vrot.slane %v656_v45, 4  ;;  %v597_v51 = vadd.f32 %v899_v48, %v1179_v11  ;;  %v588_v52 = vpop.f32.mrb[5].mxu1 }
 0x1dd   : > { %v640_v53 = vrot.slane %v639_v46, 1  ;;  %v650_v54 = vrot.slane %v649_v47, 4  ;;  %v589_v55 = vadd.f32 %v1179_v11, %v588_v52  ;;  %v900_v56 = vpop.f32.mrb[6].mxu1 }
 0x1de   : > { %v648_v57 = vmax.f32 %v646_v44, %v647_v49  ;;  %v658_v58 = vmax.f32 %v656_v45, %v657_v50  ;;  %v600_v59 = vadd.f32 %v900_v56, %v1179_v11  ;;  %v591_v60 = vpop.f32.mrb[7].mxu1  ;;  %v629_v1 = vmax.f32 %v597_v51, 0.0 }
 0x1df   : > { %v641_v61 = vmax.f32 %v639_v46, %v640_v53  ;;  %v651_v62 = vmax.f32 %v649_v47, %v650_v54  ;;  %v592_v63 = vadd.f32 %v1179_v11, %v591_v60  ;;  %v627_v5 = vmax.f32 %v589_v55, 0.0 }
 0x1e0   : > { %v659_v0 = vrot.slane %v658_v58, 2  ;;  %v630_v2 = vmax.f32 %v600_v59, 0.0 }
 0x1e1   : > { %v700_v3 = vsel %vm699_vm1, %v648_v57, %v641_v61  ;;  %v652_v4 = vrot.slane %v651_v62, 2  ;;  %v628_v6 = vmax.f32 %v592_v63, 0.0 }
 0x1e2   : > { %v660_v7 = vmax.f32 %v658_v58, %v659_v0  ;;  %v670_v8 = vmax.f32 %v629_v1, %v630_v2 }
 0x1e3   : > { %v653_v9 = vmax.f32 %v651_v62, %v652_v4  ;;  %v663_v10 = vmax.f32 %v627_v5, %v628_v6  ;;  %v903_v12 = vpop.f32.mrb[8].mxu1 }
 0x1e4   : > { %v661_v13 = vrot.slane %v660_v7, 1  ;;  %v671_v14 = vrot.slane %v670_v8, 4  ;;  %v613_v15 = vadd.f32 %v903_v12, %v1179_v11  ;;  %v604_v16 = vpop.f32.mrb[9].mxu1 }
 0x1e5   : > { %v654_v17 = vrot.slane %v653_v9, 1  ;;  %v664_v18 = vrot.slane %v663_v10, 4  ;;  %v605_v19 = vadd.f32 %v1179_v11, %v604_v16  ;;  %v904_v20 = vpop.f32.mrb[10].mxu1 }
 0x1e6   : > { %v672_v21 = vmax.f32 %v670_v8, %v671_v14  ;;  %v616_v22 = vadd.f32 %v904_v20, %v1179_v11  ;;  %v607_v23 = vpop.f32.mrb[11].mxu1  ;;  %v662_v27 = vmax.f32 %v660_v7, %v661_v13  ;;  %v633_v29 = vmax.f32 %v613_v15, 0.0 }
 0x1e7   : > { %v655_v24 = vmax.f32 %v653_v9, %v654_v17  ;;  %v665_v25 = vmax.f32 %v663_v10, %v664_v18  ;;  %v608_v26 = vadd.f32 %v1179_v11, %v607_v23  ;;  %v631_v33 = vmax.f32 %v605_v19, 0.0 }
 0x1e8   : > { %v673_v28 = vrot.slane %v672_v21, 2  ;;  %v634_v30 = vmax.f32 %v616_v22, 0.0 }
 0x1e9   : > { %v702_v31 = vsel %vm701_vm2, %v655_v24, %v700_v3  ;;  %v666_v32 = vrot.slane %v665_v25, 2  ;;  %v632_v34 = vmax.f32 %v608_v26, 0.0 }
 0x1ea   : > { %v674_v35 = vmax.f32 %v672_v21, %v673_v28  ;;  %v684_v36 = vmax.f32 %v633_v29, %v634_v30  ;;  %v704_v37 = vsel %vm703_vm3, %v662_v27, %v702_v31 }
 0x1eb   : > { %v667_v38 = vmax.f32 %v665_v25, %v666_v32  ;;  %v677_v39 = vmax.f32 %v631_v33, %v632_v34 }
 0x1ec   : > { %v675_v40 = vrot.slane %v674_v35, 1  ;;  %v685_v41 = vrot.slane %v684_v36, 4 }
 0x1ed   : > { %v668_v42 = vrot.slane %v667_v38, 1  ;;  %v678_v43 = vrot.slane %v677_v39, 4 }
 0x1ee   : > { %v686_v11 = vmax.f32 %v684_v36, %v685_v41  ;;  %v676_v46 = vmax.f32 %v674_v35, %v675_v40 }
 0x1ef   : > { %v669_v44 = vmax.f32 %v667_v38, %v668_v42  ;;  %v679_v45 = vmax.f32 %v677_v39, %v678_v43 }
 0x1f0   : > { %v687_v47 = vrot.slane %v686_v11, 2 }
 0x1f1   : > { %v680_v48 = vrot.slane %v679_v45, 2  ;;  %v706_v49 = vsel %vm705_vm4, %v669_v44, %v704_v37 }
 0x1f2   : > { %v688_v50 = vmax.f32 %v686_v11, %v687_v47  ;;  %v708_v51 = vsel %vm707_vm5, %v676_v46, %v706_v49 }
 0x1f3   : > { %v681_v52 = vmax.f32 %v679_v45, %v680_v48 }
 0x1f4   : > { %v689_v53 = vrot.slane %v688_v50, 1 }
 0x1f5   : > { %v682_v54 = vrot.slane %v681_v52, 1 }
 0x1f6   : > { %v690_v56 = vmax.f32 %v688_v50, %v689_v53 }
 0x1f7   : > { %v683_v55 = vmax.f32 %v681_v52, %v682_v54 }
 0x1f9   : > { %v710_v57 = vsel %vm709_vm6, %v683_v55, %v708_v51 }
 0x1fa   : > { %v712_v58 = vsel %vm711_vm7, %v690_v56, %v710_v57 }
 0x1fb   : > { %714 = vst [vmem:[%s218_s30] sm:$0xff] %v712_v58 }
 0x1fc   : > { %991 = shalt.err (!%p988_p3)
}
 0x1fd   : > { %s992_s14 = scalar_lea.hbm %s1202_s9, 128  ;;  %s996_s17 = scalar_lea.hbm %s1249_s5, 256 }
 0x1fe   : > { %p993_p4 = scmp.ne.s32.totalorder %s1202_s9, %s992_s14  ;;  %p997_p9 = scmp.lt.u32.totalorder %s1202_s9, %s1249_s5 }
 0x1ff   : > { %p998_p10 = scmp.lt.u32.totalorder %s996_s17, %s992_s14  ;;  %p1000_p12 = scmp.lt.u32.totalorder %s992_s14, %s1202_s9 }
 0x200   : > { %p994_p7 = pnand %p993_p4, %p1111_p5 }
 0x201   : > { %p999_p11 = por %p998_p10, %p997_p9 }
 0x202   : > { %p995_p8 = pneg %p994_p7 }
 0x203   : > { %p1001_p13 = por %p1000_p12, %p999_p11 }
 0x205   : > { %p1002_p0 = pnand %p1001_p13, %p995_p8 }
 0x207   : > { %1005 = shalt.err (!%p1002_p0)
}
 0x208   : > { %921 = dma.vmem_to_hbm [thread:$0]  (%p1111_p5), %s1204_s6, 128, %s1202_s9, %s716_s10  }
 0x209 PF: > { %p927_p1 = scmp.ge.s32.totalorder %s1040_s21, 2  ;;  %s741_s26 = sand.u32 1, %s1028_s18  }
 0x20a   : > { %s742_s30 = scalar_lea.sflag [#allocation3], %s741_s26 }
 0x20b   : > { %p924_p2 = pnand %p927_p1, %p1115_p6 }
 0x20d   : > { %1023 = dma.done.wait (!%p924_p2), %s742_s30, 128  }
 0x20e   : > { %1025 = vsyncadd (!%p924_p2), %s742_s30, 4294967168  ;;  %p15_p3 = scmp.ge.s32.totalorder %s1098_s24, 4   ;;  %s1252_s18 = smov %s1032_s19 }
 0x20f   : > { %s1253_s19 = smov %s1036_s20  ;;  %s1254_s20 = smov %s1109_s27 }
 0x210   : > { %s1255_s21 = smov %s1098_s24  ;;  %17 = sbr.rel (!%p15_p3) target bundleno = 3 (0x3), region = 75 }
 0x217   :  { %747 = vsyncpa [#allocation3], 1 }
 0x218   :  { %749 = vsyncpa [#allocation3 + $0x1], 1 }

</bundles_post_ra>
